<compile_context>
chip_gen: v7x
topology: tpu7x:2x2x1
jax: 0.10.0
libtpu: 0.0.40
codegen_flags: <defaults>
</compile_context>

<pallas_src>
import sys

import jax
import jax.numpy as jnp
from jax import lax
from jax.experimental import pallas as pl
from jax.experimental.pallas import tpu as pltpu

# Number of repeated subtractions, matching torch's forward exactly.
N_ITERS = sys.getrecursionlimit() + 1  # default 1000 -> 1001

# Unroll factor chosen to divide 1001 exactly (1001 = 7 * 11 * 13).
UNROLL = 91
N_OUTER, N_REM = divmod(N_ITERS, UNROLL)  # default: (11, 0)


def _make_deep_kernel(rows):
    """Build the kernel; split the tile into two vreg chains when aligned."""
    # Split only when both halves land on (8,128) sublane-tile boundaries so
    # the static slices are pure views (no VMEM copies).
    split = rows >= 16 and rows % 16 == 0
    half = rows // 2

    def kernel(a_ref, b_ref, c_ref, o_ref):
        one = jnp.asarray(1.0, a_ref.dtype)

        if split:
            # Two explicit independent chains -> guaranteed 2-wide ILP on the
            # dependent vsub latency chain.  c halves are loop-invariant.
            c_hi = c_ref[:half, :]
            c_lo = c_ref[half:, :]
            acc_hi = a_ref[:half, :] + b_ref[:half, :] + one
            acc_lo = a_ref[half:, :] + b_ref[half:, :] + one

            def body(_, carry):
                hi, lo = carry
                for _ in range(UNROLL):
                    hi = hi - c_hi
                    lo = lo - c_lo
                return hi, lo

            acc_hi, acc_lo = lax.fori_loop(0, N_OUTER, body, (acc_hi, acc_lo))

            # Remainder (0 at the default recursion limit), still sequential.
            for _ in range(N_REM):
                acc_hi = acc_hi - c_hi
                acc_lo = acc_lo - c_lo

            o_ref[:half, :] = acc_hi
            o_ref[half:, :] = acc_lo
        else:
            # Fallback single-chain path for small / unaligned row counts.
            c = c_ref[...]
            acc = a_ref[...] + b_ref[...] + one

            def body(_, acc):
                for _ in range(UNROLL):
                    acc = acc - c
                return acc

            acc = lax.fori_loop(0, N_OUTER, body, acc)
            for _ in range(N_REM):
                acc = acc - c
            o_ref[...] = acc

    return kernel


def deep_module_forward(a, b, c):
    assert a.shape == b.shape == c.shape
    orig_shape = a.shape
    n_elem = a.size
    # Flatten to a lane-dense (rows, 128) slab (last dim = 128 lanes).
    assert n_elem % 128 == 0, "total element count must be a multiple of 128"
    rows = n_elem // 128
    a2 = a.reshape(rows, 128)
    b2 = b.reshape(rows, 128)
    c2 = c.reshape(rows, 128)

    # Grid-less: whole arrays live in VMEM as single blocks (~32 KiB total).
    out = pl.pallas_call(
        _make_deep_kernel(rows),
        out_shape=jax.ShapeDtypeStruct((rows, 128), a.dtype),
        in_specs=[
            pl.BlockSpec(memory_space=pltpu.MemorySpace.VMEM),
            pl.BlockSpec(memory_space=pltpu.MemorySpace.VMEM),
            pl.BlockSpec(memory_space=pltpu.MemorySpace.VMEM),
        ],
        out_specs=pl.BlockSpec(memory_space=pltpu.MemorySpace.VMEM),
    )(a2, b2, c2)

    return out.reshape(orig_shape)


if __name__ == "__main__":
    key = jax.random.PRNGKey(0)
    k_a, k_b, k_c, k_w, k_bias = jax.random.split(key, 5)

    # Unused Linear(4, 4) parameters (deterministic init for module fidelity).
    linear_weight = jax.random.normal(k_w, (4, 4), jnp.float32) * 0.1  # unused
    linear_bias = jax.random.normal(k_bias, (4,), jnp.float32) * 0.1   # unused

    shape = (2, 4, 16, 16)
    a = jax.random.normal(k_a, shape, jnp.float32)
    b = jax.random.normal(k_b, shape, jnp.float32)
    c = jax.random.normal(k_c, shape, jnp.float32) * 1e-3  # keep result finite-ish

    out = deep_module_forward(a, b, c)
    out = jax.block_until_ready(out)

    # Reference check in plain JAX (same repeated-subtraction semantics).
    ref = a + b + 1.0
    ref = lax.fori_loop(0, N_ITERS, lambda _, acc: acc - c, ref)
    ref = jax.block_until_ready(ref)

    assert out.shape == shape
    assert jnp.allclose(out, ref, atol=1e-5, rtol=1e-5), "mismatch vs reference"

    print("KERNEL_OK")
</pallas_src>

<mosaic_0001>
module attributes {stable_mosaic.version = 11 : i64} {
  func.func @kernel(%arg0: memref<16x128xf32, #tpu.memory_space<vmem>>, %arg1: memref<16x128xf32, #tpu.memory_space<vmem>>, %arg2: memref<16x128xf32, #tpu.memory_space<vmem>>, %arg3: memref<16x128xf32, #tpu.memory_space<vmem>>) attributes {dimension_semantics = [], scalar_prefetch = 0 : i64, scratch_operands = 0 : i64, tpu.core_type = #tpu.core_type<tc>} {
    %c0 = arith.constant 0 : index
    %c0_0 = arith.constant 0 : index
    %0 = vector.load %arg2[%c0, %c0_0] : memref<16x128xf32, #tpu.memory_space<vmem>>, vector<8x128xf32>
    %c8 = arith.constant 8 : index
    %c0_1 = arith.constant 0 : index
    %1 = vector.load %arg2[%c8, %c0_1] : memref<16x128xf32, #tpu.memory_space<vmem>>, vector<8x128xf32>
    %c0_2 = arith.constant 0 : index
    %c0_3 = arith.constant 0 : index
    %2 = vector.load %arg0[%c0_2, %c0_3] : memref<16x128xf32, #tpu.memory_space<vmem>>, vector<8x128xf32>
    %c0_4 = arith.constant 0 : index
    %c0_5 = arith.constant 0 : index
    %3 = vector.load %arg1[%c0_4, %c0_5] : memref<16x128xf32, #tpu.memory_space<vmem>>, vector<8x128xf32>
    %4 = arith.addf %2, %3 : vector<8x128xf32>
    %cst = arith.constant 1.000000e+00 : f32
    %5 = vector.broadcast %cst : f32 to vector<8x128xf32>
    %6 = arith.addf %4, %5 : vector<8x128xf32>
    %c8_6 = arith.constant 8 : index
    %c0_7 = arith.constant 0 : index
    %7 = vector.load %arg0[%c8_6, %c0_7] : memref<16x128xf32, #tpu.memory_space<vmem>>, vector<8x128xf32>
    %c8_8 = arith.constant 8 : index
    %c0_9 = arith.constant 0 : index
    %8 = vector.load %arg1[%c8_8, %c0_9] : memref<16x128xf32, #tpu.memory_space<vmem>>, vector<8x128xf32>
    %9 = arith.addf %7, %8 : vector<8x128xf32>
    %cst_10 = arith.constant 1.000000e+00 : f32
    %10 = vector.broadcast %cst_10 : f32 to vector<8x128xf32>
    %11 = arith.addf %9, %10 : vector<8x128xf32>
    %c0_i32 = arith.constant 0 : i32
    %c11_i32 = arith.constant 11 : i32
    %12 = arith.addi %c0_i32, %c11_i32 : i32
    %c1_i32 = arith.constant 1 : i32
    %13:2 = scf.for %arg4 = %c0_i32 to %12 step %c1_i32 iter_args(%arg5 = %6, %arg6 = %11) -> (vector<8x128xf32>, vector<8x128xf32>)  : i32 {
      %16 = arith.subf %arg5, %0 : vector<8x128xf32>
      %17 = arith.subf %arg6, %1 : vector<8x128xf32>
      %18 = arith.subf %16, %0 : vector<8x128xf32>
      %19 = arith.subf %17, %1 : vector<8x128xf32>
      %20 = arith.subf %18, %0 : vector<8x128xf32>
      %21 = arith.subf %19, %1 : vector<8x128xf32>
      %22 = arith.subf %20, %0 : vector<8x128xf32>
      %23 = arith.subf %21, %1 : vector<8x128xf32>
      %24 = arith.subf %22, %0 : vector<8x128xf32>
      %25 = arith.subf %23, %1 : vector<8x128xf32>
      %26 = arith.subf %24, %0 : vector<8x128xf32>
      %27 = arith.subf %25, %1 : vector<8x128xf32>
      %28 = arith.subf %26, %0 : vector<8x128xf32>
      %29 = arith.subf %27, %1 : vector<8x128xf32>
      %30 = arith.subf %28, %0 : vector<8x128xf32>
      %31 = arith.subf %29, %1 : vector<8x128xf32>
      %32 = arith.subf %30, %0 : vector<8x128xf32>
      %33 = arith.subf %31, %1 : vector<8x128xf32>
      %34 = arith.subf %32, %0 : vector<8x128xf32>
      %35 = arith.subf %33, %1 : vector<8x128xf32>
      %36 = arith.subf %34, %0 : vector<8x128xf32>
      %37 = arith.subf %35, %1 : vector<8x128xf32>
      %38 = arith.subf %36, %0 : vector<8x128xf32>
      %39 = arith.subf %37, %1 : vector<8x128xf32>
      %40 = arith.subf %38, %0 : vector<8x128xf32>
      %41 = arith.subf %39, %1 : vector<8x128xf32>
      %42 = arith.subf %40, %0 : vector<8x128xf32>
      %43 = arith.subf %41, %1 : vector<8x128xf32>
      %44 = arith.subf %42, %0 : vector<8x128xf32>
      %45 = arith.subf %43, %1 : vector<8x128xf32>
      %46 = arith.subf %44, %0 : vector<8x128xf32>
      %47 = arith.subf %45, %1 : vector<8x128xf32>
      %48 = arith.subf %46, %0 : vector<8x128xf32>
      %49 = arith.subf %47, %1 : vector<8x128xf32>
      %50 = arith.subf %48, %0 : vector<8x128xf32>
      %51 = arith.subf %49, %1 : vector<8x128xf32>
      %52 = arith.subf %50, %0 : vector<8x128xf32>
      %53 = arith.subf %51, %1 : vector<8x128xf32>
      %54 = arith.subf %52, %0 : vector<8x128xf32>
      %55 = arith.subf %53, %1 : vector<8x128xf32>
      %56 = arith.subf %54, %0 : vector<8x128xf32>
      %57 = arith.subf %55, %1 : vector<8x128xf32>
      %58 = arith.subf %56, %0 : vector<8x128xf32>
      %59 = arith.subf %57, %1 : vector<8x128xf32>
      %60 = arith.subf %58, %0 : vector<8x128xf32>
      %61 = arith.subf %59, %1 : vector<8x128xf32>
      %62 = arith.subf %60, %0 : vector<8x128xf32>
      %63 = arith.subf %61, %1 : vector<8x128xf32>
      %64 = arith.subf %62, %0 : vector<8x128xf32>
      %65 = arith.subf %63, %1 : vector<8x128xf32>
      %66 = arith.subf %64, %0 : vector<8x128xf32>
      %67 = arith.subf %65, %1 : vector<8x128xf32>
      %68 = arith.subf %66, %0 : vector<8x128xf32>
      %69 = arith.subf %67, %1 : vector<8x128xf32>
      %70 = arith.subf %68, %0 : vector<8x128xf32>
      %71 = arith.subf %69, %1 : vector<8x128xf32>
      %72 = arith.subf %70, %0 : vector<8x128xf32>
      %73 = arith.subf %71, %1 : vector<8x128xf32>
      %74 = arith.subf %72, %0 : vector<8x128xf32>
      %75 = arith.subf %73, %1 : vector<8x128xf32>
      %76 = arith.subf %74, %0 : vector<8x128xf32>
      %77 = arith.subf %75, %1 : vector<8x128xf32>
      %78 = arith.subf %76, %0 : vector<8x128xf32>
      %79 = arith.subf %77, %1 : vector<8x128xf32>
      %80 = arith.subf %78, %0 : vector<8x128xf32>
      %81 = arith.subf %79, %1 : vector<8x128xf32>
      %82 = arith.subf %80, %0 : vector<8x128xf32>
      %83 = arith.subf %81, %1 : vector<8x128xf32>
      %84 = arith.subf %82, %0 : vector<8x128xf32>
      %85 = arith.subf %83, %1 : vector<8x128xf32>
      %86 = arith.subf %84, %0 : vector<8x128xf32>
      %87 = arith.subf %85, %1 : vector<8x128xf32>
      %88 = arith.subf %86, %0 : vector<8x128xf32>
      %89 = arith.subf %87, %1 : vector<8x128xf32>
      %90 = arith.subf %88, %0 : vector<8x128xf32>
      %91 = arith.subf %89, %1 : vector<8x128xf32>
      %92 = arith.subf %90, %0 : vector<8x128xf32>
      %93 = arith.subf %91, %1 : vector<8x128xf32>
      %94 = arith.subf %92, %0 : vector<8x128xf32>
      %95 = arith.subf %93, %1 : vector<8x128xf32>
      %96 = arith.subf %94, %0 : vector<8x128xf32>
      %97 = arith.subf %95, %1 : vector<8x128xf32>
      %98 = arith.subf %96, %0 : vector<8x128xf32>
      %99 = arith.subf %97, %1 : vector<8x128xf32>
      %100 = arith.subf %98, %0 : vector<8x128xf32>
      %101 = arith.subf %99, %1 : vector<8x128xf32>
      %102 = arith.subf %100, %0 : vector<8x128xf32>
      %103 = arith.subf %101, %1 : vector<8x128xf32>
      %104 = arith.subf %102, %0 : vector<8x128xf32>
      %105 = arith.subf %103, %1 : vector<8x128xf32>
      %106 = arith.subf %104, %0 : vector<8x128xf32>
      %107 = arith.subf %105, %1 : vector<8x128xf32>
      %108 = arith.subf %106, %0 : vector<8x128xf32>
      %109 = arith.subf %107, %1 : vector<8x128xf32>
      %110 = arith.subf %108, %0 : vector<8x128xf32>
      %111 = arith.subf %109, %1 : vector<8x128xf32>
      %112 = arith.subf %110, %0 : vector<8x128xf32>
      %113 = arith.subf %111, %1 : vector<8x128xf32>
      %114 = arith.subf %112, %0 : vector<8x128xf32>
      %115 = arith.subf %113, %1 : vector<8x128xf32>
      %116 = arith.subf %114, %0 : vector<8x128xf32>
      %117 = arith.subf %115, %1 : vector<8x128xf32>
      %118 = arith.subf %116, %0 : vector<8x128xf32>
      %119 = arith.subf %117, %1 : vector<8x128xf32>
      %120 = arith.subf %118, %0 : vector<8x128xf32>
      %121 = arith.subf %119, %1 : vector<8x128xf32>
      %122 = arith.subf %120, %0 : vector<8x128xf32>
      %123 = arith.subf %121, %1 : vector<8x128xf32>
      %124 = arith.subf %122, %0 : vector<8x128xf32>
      %125 = arith.subf %123, %1 : vector<8x128xf32>
      %126 = arith.subf %124, %0 : vector<8x128xf32>
      %127 = arith.subf %125, %1 : vector<8x128xf32>
      %128 = arith.subf %126, %0 : vector<8x128xf32>
      %129 = arith.subf %127, %1 : vector<8x128xf32>
      %130 = arith.subf %128, %0 : vector<8x128xf32>
      %131 = arith.subf %129, %1 : vector<8x128xf32>
      %132 = arith.subf %130, %0 : vector<8x128xf32>
      %133 = arith.subf %131, %1 : vector<8x128xf32>
      %134 = arith.subf %132, %0 : vector<8x128xf32>
      %135 = arith.subf %133, %1 : vector<8x128xf32>
      %136 = arith.subf %134, %0 : vector<8x128xf32>
      %137 = arith.subf %135, %1 : vector<8x128xf32>
      %138 = arith.subf %136, %0 : vector<8x128xf32>
      %139 = arith.subf %137, %1 : vector<8x128xf32>
      %140 = arith.subf %138, %0 : vector<8x128xf32>
      %141 = arith.subf %139, %1 : vector<8x128xf32>
      %142 = arith.subf %140, %0 : vector<8x128xf32>
      %143 = arith.subf %141, %1 : vector<8x128xf32>
      %144 = arith.subf %142, %0 : vector<8x128xf32>
      %145 = arith.subf %143, %1 : vector<8x128xf32>
      %146 = arith.subf %144, %0 : vector<8x128xf32>
      %147 = arith.subf %145, %1 : vector<8x128xf32>
      %148 = arith.subf %146, %0 : vector<8x128xf32>
      %149 = arith.subf %147, %1 : vector<8x128xf32>
      %150 = arith.subf %148, %0 : vector<8x128xf32>
      %151 = arith.subf %149, %1 : vector<8x128xf32>
      %152 = arith.subf %150, %0 : vector<8x128xf32>
      %153 = arith.subf %151, %1 : vector<8x128xf32>
      %154 = arith.subf %152, %0 : vector<8x128xf32>
      %155 = arith.subf %153, %1 : vector<8x128xf32>
      %156 = arith.subf %154, %0 : vector<8x128xf32>
      %157 = arith.subf %155, %1 : vector<8x128xf32>
      %158 = arith.subf %156, %0 : vector<8x128xf32>
      %159 = arith.subf %157, %1 : vector<8x128xf32>
      %160 = arith.subf %158, %0 : vector<8x128xf32>
      %161 = arith.subf %159, %1 : vector<8x128xf32>
      %162 = arith.subf %160, %0 : vector<8x128xf32>
      %163 = arith.subf %161, %1 : vector<8x128xf32>
      %164 = arith.subf %162, %0 : vector<8x128xf32>
      %165 = arith.subf %163, %1 : vector<8x128xf32>
      %166 = arith.subf %164, %0 : vector<8x128xf32>
      %167 = arith.subf %165, %1 : vector<8x128xf32>
      %168 = arith.subf %166, %0 : vector<8x128xf32>
      %169 = arith.subf %167, %1 : vector<8x128xf32>
      %170 = arith.subf %168, %0 : vector<8x128xf32>
      %171 = arith.subf %169, %1 : vector<8x128xf32>
      %172 = arith.subf %170, %0 : vector<8x128xf32>
      %173 = arith.subf %171, %1 : vector<8x128xf32>
      %174 = arith.subf %172, %0 : vector<8x128xf32>
      %175 = arith.subf %173, %1 : vector<8x128xf32>
      %176 = arith.subf %174, %0 : vector<8x128xf32>
      %177 = arith.subf %175, %1 : vector<8x128xf32>
      %178 = arith.subf %176, %0 : vector<8x128xf32>
      %179 = arith.subf %177, %1 : vector<8x128xf32>
      %180 = arith.subf %178, %0 : vector<8x128xf32>
      %181 = arith.subf %179, %1 : vector<8x128xf32>
      %182 = arith.subf %180, %0 : vector<8x128xf32>
      %183 = arith.subf %181, %1 : vector<8x128xf32>
      %184 = arith.subf %182, %0 : vector<8x128xf32>
      %185 = arith.subf %183, %1 : vector<8x128xf32>
      %186 = arith.subf %184, %0 : vector<8x128xf32>
      %187 = arith.subf %185, %1 : vector<8x128xf32>
      %188 = arith.subf %186, %0 : vector<8x128xf32>
      %189 = arith.subf %187, %1 : vector<8x128xf32>
      %190 = arith.subf %188, %0 : vector<8x128xf32>
      %191 = arith.subf %189, %1 : vector<8x128xf32>
      %192 = arith.subf %190, %0 : vector<8x128xf32>
      %193 = arith.subf %191, %1 : vector<8x128xf32>
      %194 = arith.subf %192, %0 : vector<8x128xf32>
      %195 = arith.subf %193, %1 : vector<8x128xf32>
      %196 = arith.subf %194, %0 : vector<8x128xf32>
      %197 = arith.subf %195, %1 : vector<8x128xf32>
      scf.yield %196, %197 : vector<8x128xf32>, vector<8x128xf32>
    }
    %c0_11 = arith.constant 0 : index
    %c0_12 = arith.constant 0 : index
    %14 = vector.load %arg3[%c0_11, %c0_12] : memref<16x128xf32, #tpu.memory_space<vmem>>, vector<8x128xf32>
    tpu.vector_store %arg3[%c0_11, %c0_12], %13#0 {strides = array<i32>} : memref<16x128xf32, #tpu.memory_space<vmem>>, vector<8x128xf32>,
    %c8_13 = arith.constant 8 : index
    %c0_14 = arith.constant 0 : index
    %15 = vector.load %arg3[%c8_13, %c0_14] : memref<16x128xf32, #tpu.memory_space<vmem>>, vector<8x128xf32>
    tpu.vector_store %arg3[%c8_13, %c0_14], %13#1 {strides = array<i32>} : memref<16x128xf32, #tpu.memory_space<vmem>>, vector<8x128xf32>,
    return
  }
}

</mosaic_0001>

<bundles_post_ra>
// kernel: tpu_custom_call.1
= control target key start
LH: loop header
LB: loop body
LE: loop exit
PB: predicated region body
PF: predicated region fallthrough
CT: control target
= control target key end

     0   :  { %8 = vsyncpa [#allocation3], 0  ;;  %s732_s0 = inlined_call_operand.hbm [shape: f32[16,128], index: 0, kind: input, shape index: {}]   ;;  %s733_s1 = inlined_call_operand.hbm [shape: f32[16,128], index: 1, kind: input, shape index: {}]   ;;  %s734_s2 = inlined_call_operand.hbm [shape: f32[16,128], index: 2, kind: input, shape index: {}]   ;;  %s735_s3 = inlined_call_operand.hbm [shape: f32[16,128], index: 3, kind: output, shape index: {}]  }
   0x1   :  { %9 = vsyncpa [#allocation6], 0 }
   0x2   :  { %10 = vsyncpa [#allocation4], 0  ;;  %s435_s12 = smov [#allocation5]   ;;  %s436_s14 = smov [#allocation2]  }
   0x3   :  { %s28_s13 = sshll.u32 %s435_s12, 4  ;;  %s16_s15 = sshll.u32 %s436_s14, 4  ;;  %s29_s13 = int_to_ptr.vmem [resolvable:$true] %s28_s13  ;;  %s461_s15 = int_to_ptr.vmem [resolvable:$true] %s16_s15 }
   0x4   :  { %s317_s18 = scalar_lea.hbm %s733_s1, 256 }
   0x5   :  { %p318_p0 = scmp.ne.s32.totalorder %s733_s1, %s317_s18  ;;  %p321_p1 = scmp.lt.u32.totalorder %s317_s18, %s733_s1 }
   0x7   :  { %p323_p2 = pnand %p321_p1, %p318_p0 }
   0x9   :  { %326 = shalt.err (!%p323_p2)
}
   0xa   :  { %s327_s23 = scalar_lea.vmem %s29_s13, 256  ;;  %p332_p4 = scmp.lt.s32.totalorder %s29_s13, %s29_s13 }
   0xb   :  { %p328_p3 = scmp.ne.s32.totalorder %s29_s13, %s327_s23  ;;  %p333_p5 = scmp.lt.s32.totalorder %s327_s23, %s327_s23 }
   0xd   :  { %p334_p6 = por %p333_p5, %p332_p4 }
   0xf   :  { %p335_p7 = pnand %p334_p6, %p328_p3 }
  0x11   :  { %338 = shalt.err (!%p335_p7)
}
  0x12   :  { %s437_s24 = smov 128   ;;  %s438_s25 = smov 8  }
  0x13   :  { %34 = dma.hbm_to_vmem [thread:$0]  %s733_s1, 256, %s29_s13, [#allocation6], %s437_s24, %s437_s24, %s438_s25  }
  0x14   :  { %s339_s30 = scalar_lea.hbm %s732_s0, 256 }
  0x15   :  { %p340_p8 = scmp.ne.s32.totalorder %s732_s0, %s339_s30  ;;  %p343_p9 = scmp.lt.u32.totalorder %s339_s30, %s732_s0 }
  0x17   :  { %p345_p10 = pnand %p343_p9, %p340_p8 }
  0x19   :  { %348 = shalt.err (!%p345_p10)
}
  0x1a   :  { %s349_s8 = scalar_lea.vmem %s461_s15, 256  ;;  %p354_p12 = scmp.lt.s32.totalorder %s461_s15, %s461_s15 }
  0x1b   :  { %p350_p11 = scmp.ne.s32.totalorder %s461_s15, %s349_s8  ;;  %p355_p13 = scmp.lt.s32.totalorder %s349_s8, %s349_s8 }
  0x1d   :  { %p356_p0 = por %p355_p13, %p354_p12 }
  0x1f   :  { %p357_p1 = pnand %p356_p0, %p350_p11 }
  0x21   :  { %360 = shalt.err (!%p357_p1)
}
  0x22   :  { %22 = dma.hbm_to_vmem [thread:$0]  %s732_s0, 256, %s461_s15, [#allocation3], %s437_s24, %s437_s24, %s438_s25  }
  0x23   :  { %s439_s10 = smov [#allocation7]   ;;  %s361_s14 = scalar_lea.hbm %s734_s2, 256 }
  0x24   :  { %s40_s11 = sshll.u32 %s439_s10, 4  ;;  %p362_p2 = scmp.ne.s32.totalorder %s734_s2, %s361_s14  ;;  %s41_s11 = int_to_ptr.vmem [resolvable:$true] %s40_s11 }
  0x25   :  { %p365_p3 = scmp.lt.u32.totalorder %s361_s14, %s734_s2 }
  0x27   :  { %p367_p4 = pnand %p365_p3, %p362_p2 }
  0x29   :  { %370 = shalt.err (!%p367_p4)
}
  0x2a   :  { %s371_s20 = scalar_lea.vmem %s41_s11, 256  ;;  %p376_p6 = scmp.lt.s32.totalorder %s41_s11, %s41_s11 }
  0x2b   :  { %p372_p5 = scmp.ne.s32.totalorder %s41_s11, %s371_s20  ;;  %p377_p7 = scmp.lt.s32.totalorder %s371_s20, %s371_s20 }
  0x2d   :  { %p378_p8 = por %p377_p7, %p376_p6 }
  0x2f   :  { %p379_p9 = pnand %p378_p8, %p372_p5 }
  0x31   :  { %382 = shalt.err (!%p379_p9)
}
  0x32   :  { %46 = dma.hbm_to_vmem [thread:$0]  %s734_s2, 256, %s41_s11, [#allocation6], %s437_s24, %s437_s24, %s438_s25  }
  0x33   :  { %417 = dma.done.wait [#allocation3], 256  }
  0x34   :  { %418 = vsyncadd [#allocation3], 4294967040 }
  0x35   :  { %419 = dma.done.wait [#allocation6], 512  }
  0x36   :  { %420 = vsyncadd [#allocation6], 4294966784  ;;  %v513_v0 = vld [vmem:[#allocation7] sm:$0xff]  ;;  %v515_v1 = vld [vmem:[#allocation7 + $0x8] sm:$0xff]  ;;  %s521_s2 = smov 0  }
  0x37   :  { %v58_v2 = vld [vmem:[#allocation2] sm:$0xff]  ;;  %v59_v3 = vld [vmem:[#allocation5] sm:$0xff]  ;;  %v62_v4 = vld [vmem:[#allocation2 + $0x8] sm:$0xff] }
  0x38   :  { %v63_v5 = vld [vmem:[#allocation5 + $0x8] sm:$0xff]  ;;  %v60_v6 = vadd.f32 %v59_v3, %v58_v2 }
  0x39   :  { %v64_v7 = vadd.f32 %v63_v5, %v62_v4 }
  0x3a   :  { %v61_v8 = vadd.f32 1.0, %v60_v6  }
  0x3b   :  { %v65_v9 = vadd.f32 1.0, %v64_v7  }
  0x3c LB: > { %v74_v10 = vsub.f32 %v429_v8, %v513_v0  ;;  %v75_v11 = vsub.f32 %v425_v9, %v515_v1  ;;  %s71_s2 = sadd.s32 1, %s433_s2   ;;  %s433_s2 = sphi %s521_s2, %s71_s2   ;;  %v429_v8 = vphi %v61_v8, %v737_v8   ;;  %v425_v9 = vphi %v65_v9, %v736_v9  }
  0x3d   : > { %p68_p10 = scmp.ge.s32.totalorder %s71_s2, 11  }
  0x3e   : > { %v76_v12 = vsub.f32 %v74_v10, %v513_v0  ;;  %v77_v13 = vsub.f32 %v75_v11, %v515_v1  ;;  %s440_s21 = smov (%p68_p10), [#allocation8]  }
  0x3f   :  { %s263_s22 = sshll.u32 (%p68_p10), %s440_s21, 4  ;;  %s264_s22 = int_to_ptr.vmem [resolvable:$true] %s263_s22 }
  0x40   : > { %v78_v14 = vsub.f32 %v76_v12, %v513_v0  ;;  %v79_v15 = vsub.f32 %v77_v13, %v515_v1  ;;  %s383_s23 = scalar_lea.vmem (%p68_p10), %s264_s22, 256  ;;  %p388_p12 = scmp.lt.s32.totalorder (%p68_p10), %s264_s22, %s264_s22 }
  0x41   :  { %p384_p11 = scmp.ne.s32.totalorder (%p68_p10), %s264_s22, %s383_s23  ;;  %p389_p13 = scmp.lt.s32.totalorder (%p68_p10), %s383_s23, %s383_s23 }
  0x42   : > { %v80_v16 = vsub.f32 %v78_v14, %v513_v0  ;;  %v81_v17 = vsub.f32 %v79_v15, %v515_v1 }
  0x43   :  { %p390_p0 = por (%p68_p10), %p389_p13, %p388_p12 }
  0x44   : > { %v82_v18 = vsub.f32 %v80_v16, %v513_v0  ;;  %v83_v19 = vsub.f32 %v81_v17, %v515_v1 }
  0x45   :  { %p391_p1 = pnand (%p68_p10), %p390_p0, %p384_p11 }
  0x46   : > { %v84_v20 = vsub.f32 %v82_v18, %v513_v0  ;;  %v85_v21 = vsub.f32 %v83_v19, %v515_v1 }
  0x48   : > { %v86_v22 = vsub.f32 %v84_v20, %v513_v0  ;;  %v87_v23 = vsub.f32 %v85_v21, %v515_v1 }
  0x4a   : > { %v88_v24 = vsub.f32 %v86_v22, %v513_v0  ;;  %v89_v25 = vsub.f32 %v87_v23, %v515_v1 }
  0x4c   : > { %v90_v26 = vsub.f32 %v88_v24, %v513_v0  ;;  %v91_v27 = vsub.f32 %v89_v25, %v515_v1 }
  0x4e   : > { %v92_v28 = vsub.f32 %v90_v26, %v513_v0  ;;  %v93_v29 = vsub.f32 %v91_v27, %v515_v1 }
  0x50   : > { %v94_v30 = vsub.f32 %v92_v28, %v513_v0  ;;  %v95_v31 = vsub.f32 %v93_v29, %v515_v1 }
  0x52   : > { %v96_v32 = vsub.f32 %v94_v30, %v513_v0  ;;  %v97_v33 = vsub.f32 %v95_v31, %v515_v1 }
  0x54   : > { %v98_v34 = vsub.f32 %v96_v32, %v513_v0  ;;  %v99_v35 = vsub.f32 %v97_v33, %v515_v1 }
  0x56   : > { %v100_v36 = vsub.f32 %v98_v34, %v513_v0  ;;  %v101_v37 = vsub.f32 %v99_v35, %v515_v1 }
  0x58   : > { %v102_v38 = vsub.f32 %v100_v36, %v513_v0  ;;  %v103_v39 = vsub.f32 %v101_v37, %v515_v1 }
  0x5a   : > { %v104_v40 = vsub.f32 %v102_v38, %v513_v0  ;;  %v105_v41 = vsub.f32 %v103_v39, %v515_v1 }
  0x5c   : > { %v106_v42 = vsub.f32 %v104_v40, %v513_v0  ;;  %v107_v43 = vsub.f32 %v105_v41, %v515_v1 }
  0x5e   : > { %v108_v44 = vsub.f32 %v106_v42, %v513_v0  ;;  %v109_v45 = vsub.f32 %v107_v43, %v515_v1 }
  0x60   : > { %v110_v46 = vsub.f32 %v108_v44, %v513_v0  ;;  %v111_v47 = vsub.f32 %v109_v45, %v515_v1 }
  0x62   : > { %v112_v48 = vsub.f32 %v110_v46, %v513_v0  ;;  %v113_v49 = vsub.f32 %v111_v47, %v515_v1 }
  0x64   : > { %v114_v50 = vsub.f32 %v112_v48, %v513_v0  ;;  %v115_v51 = vsub.f32 %v113_v49, %v515_v1 }
  0x66   : > { %v116_v52 = vsub.f32 %v114_v50, %v513_v0  ;;  %v117_v53 = vsub.f32 %v115_v51, %v515_v1 }
  0x68   : > { %v118_v54 = vsub.f32 %v116_v52, %v513_v0  ;;  %v119_v55 = vsub.f32 %v117_v53, %v515_v1 }
  0x6a   : > { %v120_v56 = vsub.f32 %v118_v54, %v513_v0  ;;  %v121_v57 = vsub.f32 %v119_v55, %v515_v1 }
  0x6c   : > { %v122_v58 = vsub.f32 %v120_v56, %v513_v0  ;;  %v123_v59 = vsub.f32 %v121_v57, %v515_v1 }
  0x6e   : > { %v124_v60 = vsub.f32 %v122_v58, %v513_v0  ;;  %v125_v61 = vsub.f32 %v123_v59, %v515_v1 }
  0x70   : > { %v126_v62 = vsub.f32 %v124_v60, %v513_v0  ;;  %v127_v63 = vsub.f32 %v125_v61, %v515_v1 }
  0x72   : > { %v128_v2 = vsub.f32 %v126_v62, %v513_v0  ;;  %v129_v3 = vsub.f32 %v127_v63, %v515_v1 }
  0x74   : > { %v130_v4 = vsub.f32 %v128_v2, %v513_v0  ;;  %v131_v5 = vsub.f32 %v129_v3, %v515_v1 }
  0x76   : > { %v132_v6 = vsub.f32 %v130_v4, %v513_v0  ;;  %v133_v7 = vsub.f32 %v131_v5, %v515_v1 }
  0x78   : > { %v134_v8 = vsub.f32 %v132_v6, %v513_v0  ;;  %v135_v9 = vsub.f32 %v133_v7, %v515_v1 }
  0x7a   : > { %v136_v10 = vsub.f32 %v134_v8, %v513_v0  ;;  %v137_v11 = vsub.f32 %v135_v9, %v515_v1 }
  0x7c   : > { %v138_v12 = vsub.f32 %v136_v10, %v513_v0  ;;  %v139_v13 = vsub.f32 %v137_v11, %v515_v1 }
  0x7e   : > { %v140_v14 = vsub.f32 %v138_v12, %v513_v0  ;;  %v141_v15 = vsub.f32 %v139_v13, %v515_v1 }
  0x80   : > { %v142_v16 = vsub.f32 %v140_v14, %v513_v0  ;;  %v143_v17 = vsub.f32 %v141_v15, %v515_v1 }
  0x82   : > { %v144_v18 = vsub.f32 %v142_v16, %v513_v0  ;;  %v145_v19 = vsub.f32 %v143_v17, %v515_v1 }
  0x84   : > { %v146_v20 = vsub.f32 %v144_v18, %v513_v0  ;;  %v147_v21 = vsub.f32 %v145_v19, %v515_v1 }
  0x86   : > { %v148_v22 = vsub.f32 %v146_v20, %v513_v0  ;;  %v149_v23 = vsub.f32 %v147_v21, %v515_v1 }
  0x88   : > { %v150_v24 = vsub.f32 %v148_v22, %v513_v0  ;;  %v151_v25 = vsub.f32 %v149_v23, %v515_v1 }
  0x8a   : > { %v152_v26 = vsub.f32 %v150_v24, %v513_v0  ;;  %v153_v27 = vsub.f32 %v151_v25, %v515_v1 }
  0x8c   : > { %v154_v28 = vsub.f32 %v152_v26, %v513_v0  ;;  %v155_v29 = vsub.f32 %v153_v27, %v515_v1 }
  0x8e   : > { %v156_v30 = vsub.f32 %v154_v28, %v513_v0  ;;  %v157_v31 = vsub.f32 %v155_v29, %v515_v1 }
  0x90   : > { %v158_v32 = vsub.f32 %v156_v30, %v513_v0  ;;  %v159_v33 = vsub.f32 %v157_v31, %v515_v1 }
  0x92   : > { %v160_v34 = vsub.f32 %v158_v32, %v513_v0  ;;  %v161_v35 = vsub.f32 %v159_v33, %v515_v1 }
  0x94   : > { %v162_v36 = vsub.f32 %v160_v34, %v513_v0  ;;  %v163_v37 = vsub.f32 %v161_v35, %v515_v1 }
  0x96   : > { %v164_v38 = vsub.f32 %v162_v36, %v513_v0  ;;  %v165_v39 = vsub.f32 %v163_v37, %v515_v1 }
  0x98   : > { %v166_v40 = vsub.f32 %v164_v38, %v513_v0  ;;  %v167_v41 = vsub.f32 %v165_v39, %v515_v1 }
  0x9a   : > { %v168_v42 = vsub.f32 %v166_v40, %v513_v0  ;;  %v169_v43 = vsub.f32 %v167_v41, %v515_v1 }
  0x9c   : > { %v170_v44 = vsub.f32 %v168_v42, %v513_v0  ;;  %v171_v45 = vsub.f32 %v169_v43, %v515_v1 }
  0x9e   : > { %v172_v46 = vsub.f32 %v170_v44, %v513_v0  ;;  %v173_v47 = vsub.f32 %v171_v45, %v515_v1 }
  0xa0   : > { %v174_v48 = vsub.f32 %v172_v46, %v513_v0  ;;  %v175_v49 = vsub.f32 %v173_v47, %v515_v1 }
  0xa2   : > { %v176_v50 = vsub.f32 %v174_v48, %v513_v0  ;;  %v177_v51 = vsub.f32 %v175_v49, %v515_v1 }
  0xa4   : > { %v178_v52 = vsub.f32 %v176_v50, %v513_v0  ;;  %v179_v53 = vsub.f32 %v177_v51, %v515_v1 }
  0xa6   : > { %v180_v54 = vsub.f32 %v178_v52, %v513_v0  ;;  %v181_v55 = vsub.f32 %v179_v53, %v515_v1 }
  0xa8   : > { %v182_v56 = vsub.f32 %v180_v54, %v513_v0  ;;  %v183_v57 = vsub.f32 %v181_v55, %v515_v1 }
  0xaa   : > { %v184_v58 = vsub.f32 %v182_v56, %v513_v0  ;;  %v185_v59 = vsub.f32 %v183_v57, %v515_v1 }
  0xac   : > { %v186_v60 = vsub.f32 %v184_v58, %v513_v0  ;;  %v187_v61 = vsub.f32 %v185_v59, %v515_v1 }
  0xae   : > { %v188_v62 = vsub.f32 %v186_v60, %v513_v0  ;;  %v189_v63 = vsub.f32 %v187_v61, %v515_v1 }
  0xb0   : > { %v190_v2 = vsub.f32 %v188_v62, %v513_v0  ;;  %v191_v3 = vsub.f32 %v189_v63, %v515_v1 }
  0xb2   : > { %v192_v4 = vsub.f32 %v190_v2, %v513_v0  ;;  %v193_v5 = vsub.f32 %v191_v3, %v515_v1 }
  0xb4   : > { %v194_v6 = vsub.f32 %v192_v4, %v513_v0  ;;  %v195_v7 = vsub.f32 %v193_v5, %v515_v1 }
  0xb6   : > { %v196_v8 = vsub.f32 %v194_v6, %v513_v0  ;;  %v197_v9 = vsub.f32 %v195_v7, %v515_v1 }
  0xb8   : > { %v198_v10 = vsub.f32 %v196_v8, %v513_v0  ;;  %v199_v11 = vsub.f32 %v197_v9, %v515_v1 }
  0xba   : > { %v200_v12 = vsub.f32 %v198_v10, %v513_v0  ;;  %v201_v13 = vsub.f32 %v199_v11, %v515_v1 }
  0xbc   : > { %v202_v14 = vsub.f32 %v200_v12, %v513_v0  ;;  %v203_v15 = vsub.f32 %v201_v13, %v515_v1 }
  0xbe   : > { %v204_v16 = vsub.f32 %v202_v14, %v513_v0  ;;  %v205_v17 = vsub.f32 %v203_v15, %v515_v1 }
  0xc0   : > { %v206_v18 = vsub.f32 %v204_v16, %v513_v0  ;;  %v207_v19 = vsub.f32 %v205_v17, %v515_v1 }
  0xc2   : > { %v208_v20 = vsub.f32 %v206_v18, %v513_v0  ;;  %v209_v21 = vsub.f32 %v207_v19, %v515_v1 }
  0xc4   : > { %v210_v22 = vsub.f32 %v208_v20, %v513_v0  ;;  %v211_v23 = vsub.f32 %v209_v21, %v515_v1 }
  0xc6   : > { %v212_v24 = vsub.f32 %v210_v22, %v513_v0  ;;  %v213_v25 = vsub.f32 %v211_v23, %v515_v1 }
  0xc8   : > { %v214_v26 = vsub.f32 %v212_v24, %v513_v0  ;;  %v215_v27 = vsub.f32 %v213_v25, %v515_v1 }
  0xca   : > { %v216_v28 = vsub.f32 %v214_v26, %v513_v0  ;;  %v217_v29 = vsub.f32 %v215_v27, %v515_v1 }
  0xcc   : > { %v218_v30 = vsub.f32 %v216_v28, %v513_v0  ;;  %v219_v31 = vsub.f32 %v217_v29, %v515_v1 }
  0xce   : > { %v220_v32 = vsub.f32 %v218_v30, %v513_v0  ;;  %v221_v33 = vsub.f32 %v219_v31, %v515_v1 }
  0xd0   : > { %v222_v34 = vsub.f32 %v220_v32, %v513_v0  ;;  %v223_v35 = vsub.f32 %v221_v33, %v515_v1 }
  0xd2   : > { %v224_v36 = vsub.f32 %v222_v34, %v513_v0  ;;  %v225_v37 = vsub.f32 %v223_v35, %v515_v1 }
  0xd4   : > { %v226_v38 = vsub.f32 %v224_v36, %v513_v0  ;;  %v227_v39 = vsub.f32 %v225_v37, %v515_v1 }
  0xd6   : > { %v228_v40 = vsub.f32 %v226_v38, %v513_v0  ;;  %v229_v41 = vsub.f32 %v227_v39, %v515_v1 }
  0xd8   : > { %v230_v42 = vsub.f32 %v228_v40, %v513_v0  ;;  %v231_v43 = vsub.f32 %v229_v41, %v515_v1 }
  0xda   : > { %v232_v44 = vsub.f32 %v230_v42, %v513_v0  ;;  %v233_v45 = vsub.f32 %v231_v43, %v515_v1 }
  0xdc   : > { %v234_v46 = vsub.f32 %v232_v44, %v513_v0  ;;  %v235_v47 = vsub.f32 %v233_v45, %v515_v1 }
  0xde   : > { %v236_v48 = vsub.f32 %v234_v46, %v513_v0  ;;  %v237_v49 = vsub.f32 %v235_v47, %v515_v1 }
  0xe0   : > { %v238_v50 = vsub.f32 %v236_v48, %v513_v0  ;;  %v239_v51 = vsub.f32 %v237_v49, %v515_v1 }
  0xe2   : > { %v240_v52 = vsub.f32 %v238_v50, %v513_v0  ;;  %v241_v53 = vsub.f32 %v239_v51, %v515_v1 }
  0xe4   : > { %v242_v54 = vsub.f32 %v240_v52, %v513_v0  ;;  %v243_v55 = vsub.f32 %v241_v53, %v515_v1 }
  0xe6   : > { %v244_v56 = vsub.f32 %v242_v54, %v513_v0  ;;  %v245_v57 = vsub.f32 %v243_v55, %v515_v1 }
  0xe8   : > { %v246_v58 = vsub.f32 %v244_v56, %v513_v0  ;;  %v247_v59 = vsub.f32 %v245_v57, %v515_v1 }
  0xea   : > { %v248_v60 = vsub.f32 %v246_v58, %v513_v0  ;;  %v249_v61 = vsub.f32 %v247_v59, %v515_v1 }
  0xec   : > { %v250_v62 = vsub.f32 %v248_v60, %v513_v0  ;;  %v251_v63 = vsub.f32 %v249_v61, %v515_v1  ;;  %70 = sbr.rel (!%p68_p10) target bundleno = 60 (0x3c), region = 51 }
  0xee   : > { %v252_v2 = vsub.f32 %v250_v62, %v513_v0  ;;  %v253_v3 = vsub.f32 %v251_v63, %v515_v1 }
  0xf0   : > { %v254_v4 = vsub.f32 %v252_v2, %v513_v0   ;;  %v255_v5 = vsub.f32 %v253_v3, %v515_v1  }
  0xf2   : > { %v736_v9 = vmov %v255_v5  ;;  %v737_v8 = vmov %v254_v4  ;;  %256 = vst [vmem:[#allocation8] sm:$0xff] (%p68_p10), %v254_v4  ;;  %257 = vst [vmem:[#allocation8 + $0x8] sm:$0xff] (%p68_p10), %v255_v5 }
  0xf3   :  { %394 = shalt.err (!%p391_p1)
}
  0xf4   :  { %s395_s28 = scalar_lea.hbm %s735_s3, 256 }
  0xf5   :  { %p396_p2 = scmp.ne.s32.totalorder %s735_s3, %s395_s28  ;;  %p399_p3 = scmp.lt.u32.totalorder %s395_s28, %s735_s3 }
  0xf7   :  { %p401_p4 = pnand %p399_p3, %p396_p2 }
  0xf9   :  { %404 = shalt.err (!%p401_p4)
}
  0xfa   :  { %269 = dma.vmem_to_hbm [thread:$0]  %s264_s22, 256, %s735_s3, [#allocation4], %s437_s24, %s437_s24, %s438_s25  }
  0xfb   :  { %421 = dma.done.wait [#allocation4], 256  }
  0xfc   :  { %422 = vsyncadd [#allocation4], 4294967040 }
  0xfd   :  { %273 = vsyncpa [#allocation3], 1 }
  0xfe   :  { %274 = vsyncpa [#allocation6], 1 }
  0xff   :  { %275 = vsyncpa [#allocation4], 1 }

</bundles_post_ra>
